<compile_context>
chip_gen: v6e
topology: v6e:2x2x1
jax: 0.10.0
libtpu: 0.0.40
codegen_flags: <defaults>
</compile_context>

<pallas_src>
import functools

import jax
import jax.numpy as jnp
from jax.experimental import pallas as pl
from jax.experimental.pallas import tpu as pltpu


def _round_up(x, m):
    return ((x + m - 1) // m) * m


def seem_kernel(x1_ref, x2_ref, w1_ref, b1_ref, w2_ref, b2_ref, wred_ref,
                o_ref, *, hw_valid):
    """One grid step: x1 block (Bn, C1p, HWp), x2 block (Bn, C2p, HWp)."""
    bn, _, hwp = x1_ref.shape

    # Small operands: load once, hoisted out of the per-sample loop.
    w1 = w1_ref[...]                       # (C1p, C1p) f32
    b1 = b1_ref[...]                       # (C1p, 1)
    w2 = w2_ref[...]                       # (C2p, C2p)
    b2 = b2_ref[...]                       # (C2p, 1)
    wred = wred_ref[...]                   # (1, C2p)

    # Lane mask for spatial padding (static trace-time decision).
    if hwp > hw_valid:
        lane = jax.lax.broadcasted_iota(jnp.int32, (1, hwp), 1)
        lane_mask = (lane < hw_valid).astype(jnp.float32)
    else:
        lane_mask = None

    # Unrolled loop over samples in this block; batching only enlarges the DMA
    # block and amortizes grid-step overhead, while each matmul stays 2-D.
    for i in range(bn):
        x1i = x1_ref[i].astype(jnp.float32)     # (C1p, HWp) compute in f32
        x2i = x2_ref[i].astype(jnp.float32)     # (C2p, HWp)

        # 1x1 conv (+ folded BN) + sigmoid.
        t1 = jax.nn.sigmoid(
            jnp.dot(w1, x1i, preferred_element_type=jnp.float32) + b1)
        t2 = jax.nn.sigmoid(
            jnp.dot(w2, x2i, preferred_element_type=jnp.float32) + b2)
        if lane_mask is not None:
            t2 = t2 * lane_mask                 # zero padded spatial lanes

        # Affinity: contract over spatial, (C1p, HWp) x (C2p, HWp)^T.
        aff = jax.lax.dot_general(
            t1, t2, (((1,), (1,)), ((), ())),
            preferred_element_type=jnp.float32)  # (C1p, C2p)

        # dim_reduce conv1d as VPU multiply + cross-lane (XLU) reduce; the
        # matmul form would have a single useful output lane on the MXU.
        a = jnp.sum(aff * wred, axis=1, keepdims=True)   # (C1p, 1)

        o_ref[i] = (x1i * a).astype(o_ref.dtype)


_VMEM_BUDGET_BYTES = 40 * 1024 * 1024   # conservative across v5e/v6e/v7x


def spectral_enhance_pallas(x1, x2, w1e, b1e, w2e, b2e, wred, *,
                            storage_dtype=jnp.bfloat16, max_block_n=8):
    """x1: (N, C1, H, W); x2: (N, C2, H, W); BN already folded into w*/b*."""
    N, C1, H, W = x1.shape
    N2, C2, H2, W2 = x2.shape
    assert N2 == N and H2 * W2 == H * W, "matmul requires matching spatial size"
    HW = H * W

    out_dtype = x1.dtype
    HWp = _round_up(HW, 128)                 # lane-dense stores
    C1p = _round_up(max(C1, 1), 8)           # sublane alignment
    C2p = _round_up(max(C2, 1), 8)

    in_bytes = jnp.dtype(storage_dtype).itemsize
    out_bytes = jnp.dtype(out_dtype).itemsize
    # Double-buffered input + output footprint per sample.
    per_sample = 2 * ((C1p + C2p) * HWp * in_bytes + C1p * HWp * out_bytes)
    bn = max(1, _VMEM_BUDGET_BYTES // per_sample)
    bn = min(bn, max_block_n)
    if N > 1:
        bn = min(bn, (N + 1) // 2)           # keep >=2 grid steps (v7x: 2 TCs)
    bn = max(1, min(bn, N))
    # TODO(synk): for HW so large that even one (C, HWp) slab exceeds VMEM
    # (v7x: 64 MiB physical), split into a reduce pass (-> a) + scale pass.

    Np = _round_up(N, bn)
    grid_n = Np // bn

    x1f = jnp.pad(x1.reshape(N, C1, HW),
                  ((0, Np - N), (0, C1p - C1), (0, HWp - HW))).astype(storage_dtype)
    x2f = jnp.pad(x2.reshape(N, C2, HW),
                  ((0, Np - N), (0, C2p - C2), (0, HWp - HW))).astype(storage_dtype)
    w1p = jnp.pad(w1e, ((0, C1p - C1), (0, C1p - C1))).astype(jnp.float32)
    b1p = jnp.pad(b1e, (0, C1p - C1)).reshape(C1p, 1).astype(jnp.float32)
    w2p = jnp.pad(w2e, ((0, C2p - C2), (0, C2p - C2))).astype(jnp.float32)
    b2p = jnp.pad(b2e, (0, C2p - C2)).reshape(C2p, 1).astype(jnp.float32)
    wredp = jnp.pad(wred, (0, C2p - C2)).reshape(1, C2p).astype(jnp.float32)

    block_bytes = bn * HWp * ((C1p + C2p) * in_bytes + C1p * out_bytes)
    vmem_limit = int(min(48 * 1024 * 1024,
                         max(32 * 1024 * 1024, 4 * block_bytes)))

    out = pl.pallas_call(
        functools.partial(seem_kernel, hw_valid=HW),
        out_shape=jax.ShapeDtypeStruct((Np, C1p, HWp), out_dtype),
        grid_spec=pltpu.PrefetchScalarGridSpec(
            num_scalar_prefetch=0,
            grid=(grid_n,),
            in_specs=[
                pl.BlockSpec((bn, C1p, HWp), lambda n: (n, 0, 0)),
                pl.BlockSpec((bn, C2p, HWp), lambda n: (n, 0, 0)),
                pl.BlockSpec((C1p, C1p), lambda n: (0, 0)),
                pl.BlockSpec((C1p, 1), lambda n: (0, 0)),
                pl.BlockSpec((C2p, C2p), lambda n: (0, 0)),
                pl.BlockSpec((C2p, 1), lambda n: (0, 0)),
                pl.BlockSpec((1, C2p), lambda n: (0, 0)),
            ],
            out_specs=pl.BlockSpec((bn, C1p, HWp), lambda n: (n, 0, 0)),
        ),
        compiler_params=pltpu.CompilerParams(
            dimension_semantics=("parallel",),
            vmem_limit_bytes=vmem_limit,
        ),
    )(x1f, x2f, w1p, b1p, w2p, b2p, wredp)

    return out[:N, :C1, :HW].reshape(N, C1, H, W)


def fold_bn_into_conv(w, b, gamma, beta, mean, var, eps=1e-5):
    """Fold inference-mode BatchNorm into a 1x1 conv: y = s*(Wx+b-mean)+beta."""
    s = gamma / jnp.sqrt(var + eps)
    w_eff = s[:, None] * w
    b_eff = s * (b - mean) + beta
    return w_eff, b_eff


def reference_forward(x1, x2, w1e, b1e, w2e, b2e, wred):
    """Pure-JAX reference mirroring the PyTorch forward."""
    N, C1, H, W = x1.shape
    C2 = x2.shape[1]
    HW = H * W
    x1f = x1.reshape(N, C1, HW)
    x2f = x2.reshape(N, C2, HW)
    t1 = jax.nn.sigmoid(jnp.einsum("oc,nch->noh", w1e, x1f) + b1e[None, :, None])
    t2 = jax.nn.sigmoid(jnp.einsum("oc,nch->noh", w2e, x2f) + b2e[None, :, None])
    aff = jnp.einsum("nih,njh->nij", t1, t2)          # (N, C1, C2)
    a = jnp.einsum("nij,j->ni", aff, wred)            # (N, C1)
    return x1 * a[:, :, None, None]


def _make_params(key, C1, C2):
    ks = jax.random.split(key, 9)
    w_t1 = 0.2 * jax.random.normal(ks[0], (C1, C1), dtype=jnp.float32)
    b_t1 = 0.1 * jax.random.normal(ks[1], (C1,), dtype=jnp.float32)
    gamma1 = 1.0 + 0.1 * jax.random.normal(ks[2], (C1,), dtype=jnp.float32)
    beta1 = 0.1 * jax.random.normal(ks[3], (C1,), dtype=jnp.float32)
    w_t2 = 0.2 * jax.random.normal(ks[4], (C2, C2), dtype=jnp.float32)
    b_t2 = 0.1 * jax.random.normal(ks[5], (C2,), dtype=jnp.float32)
    gamma2 = 1.0 + 0.1 * jax.random.normal(ks[6], (C2,), dtype=jnp.float32)
    beta2 = 0.1 * jax.random.normal(ks[7], (C2,), dtype=jnp.float32)
    w_red = 0.3 * jax.random.normal(ks[8], (C2,), dtype=jnp.float32)
    mean1, var1 = jnp.zeros((C1,)), jnp.ones((C1,))
    mean2, var2 = jnp.zeros((C2,)), jnp.ones((C2,))
    w1e, b1e = fold_bn_into_conv(w_t1, b_t1, gamma1, beta1, mean1, var1)
    w2e, b2e = fold_bn_into_conv(w_t2, b_t2, gamma2, beta2, mean2, var2)
    return w1e, b1e, w2e, b2e, w_red


if __name__ == "__main__":
    key = jax.random.PRNGKey(0)
    k_param, k1, k2, k3, k4 = jax.random.split(key, 5)

    # Case 1: module's small shapes, f32 storage, tight tolerance.
    N, C1, C2, H, W = 2, 4, 6, 16, 16
    w1e, b1e, w2e, b2e, w_red = _make_params(k_param, C1, C2)
    x1 = jax.random.normal(k1, (N, C1, H, W), dtype=jnp.float32)
    x2 = jax.random.normal(k2, (N, C2, H, W), dtype=jnp.float32)

    out_f32 = jax.block_until_ready(
        spectral_enhance_pallas(x1, x2, w1e, b1e, w2e, b2e, w_red,
                                storage_dtype=jnp.float32))
    ref = reference_forward(x1, x2, w1e, b1e, w2e, b2e, w_red)
    assert out_f32.shape == (N, C1, H, W)
    assert jnp.allclose(out_f32, ref, atol=1e-4, rtol=1e-4), "f32 mismatch"

    # Case 2: bf16 HBM storage (halved DMA traffic), f32 compute in-kernel.
    out_bf16 = jax.block_until_ready(
        spectral_enhance_pallas(x1, x2, w1e, b1e, w2e, b2e, w_red,
                                storage_dtype=jnp.bfloat16))
    x1q = x1.astype(jnp.bfloat16).astype(jnp.float32)
    x2q = x2.astype(jnp.bfloat16).astype(jnp.float32)
    ref_q = reference_forward(x1q, x2q, w1e, b1e, w2e, b2e, w_red)
    assert jnp.allclose(out_bf16, ref_q, atol=2e-3, rtol=2e-3), "bf16 mismatch"

    # Case 3: non-128-aligned spatial + odd batch -> exercises HW/channel/N
    # padding, in-kernel lane masking and multi-sample (bn > 1) blocks.
    N3, H3, W3 = 9, 12, 12
    x1b = jax.random.normal(k3, (N3, C1, H3, W3), dtype=jnp.float32)
    x2b = jax.random.normal(k4, (N3, C2, H3, W3), dtype=jnp.float32)
    out3 = jax.block_until_ready(
        spectral_enhance_pallas(x1b, x2b, w1e, b1e, w2e, b2e, w_red,
                                storage_dtype=jnp.float32))
    ref3 = reference_forward(x1b, x2b, w1e, b1e, w2e, b2e, w_red)
    assert out3.shape == (N3, C1, H3, W3)
    assert jnp.allclose(out3, ref3, atol=1e-4, rtol=1e-4), "padded-case mismatch"

    print("KERNEL_OK")
</pallas_src>

<mosaic_0001>
module attributes {stable_mosaic.version = 11 : i64} {
  func.func @seem_kernel(%arg0: i32, %arg1: memref<1x8x256xf32, #tpu.memory_space<vmem>>, %arg2: memref<1x8x256xf32, #tpu.memory_space<vmem>>, %arg3: memref<8x8xf32, #tpu.memory_space<vmem>>, %arg4: memref<8x1xf32, #tpu.memory_space<vmem>>, %arg5: memref<8x8xf32, #tpu.memory_space<vmem>>, %arg6: memref<8x1xf32, #tpu.memory_space<vmem>>, %arg7: memref<1x8xf32, #tpu.memory_space<vmem>>, %arg8: memref<1x8x256xf32, #tpu.memory_space<vmem>>) attributes {dimension_semantics = [#tpu.dimension_semantics<parallel>], iteration_bounds = array<i64: 2>, scalar_prefetch = 0 : i64, scratch_operands = 0 : i64, tpu.core_type = #tpu.core_type<tc>, window_params = [{transform_indices = @transform_0, window_bounds = array<i64: 1, 8, 256>}, {transform_indices = @transform_1, window_bounds = array<i64: 1, 8, 256>}, {pipeline_mode = #tpu.pipeline_mode<synchronous>, transform_indices = @transform_2, window_bounds = array<i64: 8, 8>}, {pipeline_mode = #tpu.pipeline_mode<synchronous>, transform_indices = @transform_3, window_bounds = array<i64: 8, 1>}, {pipeline_mode = #tpu.pipeline_mode<synchronous>, transform_indices = @transform_4, window_bounds = array<i64: 8, 8>}, {pipeline_mode = #tpu.pipeline_mode<synchronous>, transform_indices = @transform_5, window_bounds = array<i64: 8, 1>}, {pipeline_mode = #tpu.pipeline_mode<synchronous>, transform_indices = @transform_6, window_bounds = array<i64: 1, 8>}, {transform_indices = @transform_7, window_bounds = array<i64: 1, 8, 256>}]} {
    %c0 = arith.constant 0 : index
    %c0_0 = arith.constant 0 : index
    %0 = vector.load %arg3[%c0, %c0_0] : memref<8x8xf32, #tpu.memory_space<vmem>>, vector<8x8xf32>
    %c0_1 = arith.constant 0 : index
    %c0_2 = arith.constant 0 : index
    %1 = vector.load %arg4[%c0_1, %c0_2] : memref<8x1xf32, #tpu.memory_space<vmem>>, vector<8x1xf32>
    %c0_3 = arith.constant 0 : index
    %c0_4 = arith.constant 0 : index
    %2 = vector.load %arg5[%c0_3, %c0_4] : memref<8x8xf32, #tpu.memory_space<vmem>>, vector<8x8xf32>
    %c0_5 = arith.constant 0 : index
    %c0_6 = arith.constant 0 : index
    %3 = vector.load %arg6[%c0_5, %c0_6] : memref<8x1xf32, #tpu.memory_space<vmem>>, vector<8x1xf32>
    %c0_7 = arith.constant 0 : index
    %c0_8 = arith.constant 0 : index
    %4 = vector.load %arg7[%c0_7, %c0_8] : memref<1x8xf32, #tpu.memory_space<vmem>>, vector<1x8xf32>
    %c0_9 = arith.constant 0 : index
    %c0_10 = arith.constant 0 : index
    %c0_11 = arith.constant 0 : index
    %5 = vector.load %arg1[%c0_9, %c0_10, %c0_11] : memref<1x8x256xf32, #tpu.memory_space<vmem>>, vector<1x8x256xf32>
    %6 = vector.shape_cast %5 : vector<1x8x256xf32> to vector<8x256xf32>
    %c0_12 = arith.constant 0 : index
    %c0_13 = arith.constant 0 : index
    %c0_14 = arith.constant 0 : index
    %7 = vector.load %arg2[%c0_12, %c0_13, %c0_14] : memref<1x8x256xf32, #tpu.memory_space<vmem>>, vector<1x8x256xf32>
    %8 = vector.shape_cast %7 : vector<1x8x256xf32> to vector<8x256xf32>
    %cst = arith.constant dense<0.000000e+00> : vector<8x256xf32>
    %9 = tpu.matmul %0, %6, %cst {dimension_numbers = #tpu.dot_dimension_numbers<[1], [0], [0], [1], [0, 0, 1, 1], [], []>} : vector<8x8xf32>, vector<8x256xf32>, vector<8x256xf32> -> vector<8x256xf32>
    %10 = vector.broadcast %1 : vector<8x1xf32> to vector<8x256xf32>
    %11 = arith.addf %9, %10 : vector<8x256xf32>
    %12 = arith.negf %11 : vector<8x256xf32>
    %13 = math.exp %12 : vector<8x256xf32>
    %cst_15 = arith.constant 1.000000e+00 : f32
    %14 = vector.broadcast %cst_15 : f32 to vector<8x256xf32>
    %15 = arith.addf %14, %13 : vector<8x256xf32>
    %16 = arith.divf %14, %15 : vector<8x256xf32>
    %cst_16 = arith.constant dense<0.000000e+00> : vector<8x256xf32>
    %17 = tpu.matmul %2, %8, %cst_16 {dimension_numbers = #tpu.dot_dimension_numbers<[1], [0], [0], [1], [0, 0, 1, 1], [], []>} : vector<8x8xf32>, vector<8x256xf32>, vector<8x256xf32> -> vector<8x256xf32>
    %18 = vector.broadcast %3 : vector<8x1xf32> to vector<8x256xf32>
    %19 = arith.addf %17, %18 : vector<8x256xf32>
    %20 = arith.negf %19 : vector<8x256xf32>
    %21 = math.exp %20 : vector<8x256xf32>
    %cst_17 = arith.constant 1.000000e+00 : f32
    %22 = vector.broadcast %cst_17 : f32 to vector<8x256xf32>
    %23 = arith.addf %22, %21 : vector<8x256xf32>
    %24 = arith.divf %22, %23 : vector<8x256xf32>
    %cst_18 = arith.constant dense<0.000000e+00> : vector<8x8xf32>
    %25 = tpu.matmul %16, %24, %cst_18 {dimension_numbers = #tpu.dot_dimension_numbers<[1], [1], [0], [0], [0, 0, 1, 0], [], []>} : vector<8x256xf32>, vector<8x256xf32>, vector<8x8xf32> -> vector<8x8xf32>
    %26 = vector.broadcast %4 : vector<1x8xf32> to vector<8x8xf32>
    %27 = arith.mulf %25, %26 : vector<8x8xf32>
    %cst_19 = arith.constant dense<0.000000e+00> : vector<8xf32>
    %28 = vector.multi_reduction <add>, %27, %cst_19 [1] : vector<8x8xf32> to vector<8xf32>
    %29 = vector.shape_cast %28 : vector<8xf32> to vector<8x1xf32>
    %30 = vector.broadcast %29 : vector<8x1xf32> to vector<8x256xf32>
    %31 = arith.mulf %6, %30 : vector<8x256xf32>
    %c0_20 = arith.constant 0 : index
    %c0_21 = arith.constant 0 : index
    %c0_22 = arith.constant 0 : index
    %32 = vector.load %arg8[%c0_20, %c0_21, %c0_22] : memref<1x8x256xf32, #tpu.memory_space<vmem>>, vector<1x8x256xf32>
    %33 = vector.shape_cast %32 : vector<1x8x256xf32> to vector<8x256xf32>
    %34 = vector.shape_cast %31 : vector<8x256xf32> to vector<1x8x256xf32>
    tpu.vector_store %arg8[%c0_20, %c0_21, %c0_22], %34 {strides = array<i32>} : memref<1x8x256xf32, #tpu.memory_space<vmem>>, vector<1x8x256xf32>,
    return
  }
  func.func @transform_0(%arg0: i32) -> (i32, i32, i32) {
    %c0_i32 = arith.constant 0 : i32
    %c0_i32_0 = arith.constant 0 : i32
    %c0_i32_1 = arith.constant 0 : i32
    return %arg0, %c0_i32, %c0_i32_0 : i32, i32, i32
  }
  func.func @transform_1(%arg0: i32) -> (i32, i32, i32) {
    %c0_i32 = arith.constant 0 : i32
    %c0_i32_0 = arith.constant 0 : i32
    %c0_i32_1 = arith.constant 0 : i32
    return %arg0, %c0_i32, %c0_i32_0 : i32, i32, i32
  }
  func.func @transform_2(%arg0: i32) -> (i32, i32) {
    %c0_i32 = arith.constant 0 : i32
    %c0_i32_0 = arith.constant 0 : i32
    %c0_i32_1 = arith.constant 0 : i32
    return %c0_i32, %c0_i32_0 : i32, i32
  }
  func.func @transform_3(%arg0: i32) -> (i32, i32) {
    %c0_i32 = arith.constant 0 : i32
    %c0_i32_0 = arith.constant 0 : i32
    %c0_i32_1 = arith.constant 0 : i32
    return %c0_i32, %c0_i32_0 : i32, i32
  }
  func.func @transform_4(%arg0: i32) -> (i32, i32) {
    %c0_i32 = arith.constant 0 : i32
    %c0_i32_0 = arith.constant 0 : i32
    %c0_i32_1 = arith.constant 0 : i32
    return %c0_i32, %c0_i32_0 : i32, i32
  }
  func.func @transform_5(%arg0: i32) -> (i32, i32) {
    %c0_i32 = arith.constant 0 : i32
    %c0_i32_0 = arith.constant 0 : i32
    %c0_i32_1 = arith.constant 0 : i32
    return %c0_i32, %c0_i32_0 : i32, i32
  }
  func.func @transform_6(%arg0: i32) -> (i32, i32) {
    %c0_i32 = arith.constant 0 : i32
    %c0_i32_0 = arith.constant 0 : i32
    %c0_i32_1 = arith.constant 0 : i32
    return %c0_i32, %c0_i32_0 : i32, i32
  }
  func.func @transform_7(%arg0: i32) -> (i32, i32, i32) {
    %c0_i32 = arith.constant 0 : i32
    %c0_i32_0 = arith.constant 0 : i32
    %c0_i32_1 = arith.constant 0 : i32
    return %arg0, %c0_i32, %c0_i32_0 : i32, i32, i32
  }
}

</mosaic_0001>

<bundles_post_ra>
// kernel: tpu_custom_call.1
= control target key start
LH: loop header
LB: loop body
LE: loop exit
PB: predicated region body
PF: predicated region fallthrough
CT: control target
= control target key end

     0   :  { %s1217_s0 = inlined_call_operand.hbm [shape: f32[2,8,256], index: 0, kind: input, shape index: {}]   ;;  %s1218_s1 = inlined_call_operand.hbm [shape: f32[2,8,256], index: 1, kind: input, shape index: {}]   ;;  %s1219_s2 = inlined_call_operand.vmem [shape: f32[8,8], index: 2, kind: input, shape index: {}]   ;;  %s1220_s3 = inlined_call_operand.vmem [shape: f32[8,1], index: 3, kind: input, shape index: {}]   ;;  %s1221_s4 = inlined_call_operand.vmem [shape: f32[8,8], index: 4, kind: input, shape index: {}]   ;;  %s1222_s5 = inlined_call_operand.vmem [shape: f32[8,1], index: 5, kind: input, shape index: {}]   ;;  %s1223_s6 = inlined_call_operand.vmem [shape: f32[1,8], index: 6, kind: input, shape index: {}]   ;;  %s1224_s7 = inlined_call_operand.hbm [shape: f32[2,8,256], index: 7, kind: output, shape index: {}]  }
   0x1   :  { %1229 = sst [smem:[#allocation11_spill]] %s1217_s0 }
   0x2   :  { %12 = vsyncpa [#allocation3], 0 }
   0x3   :  { %14 = vsyncpa [#allocation3 + $0x1], 0 }
   0x4   :  { %15 = vsyncpa [#allocation6], 0 }
   0x5   :  { %17 = vsyncpa [#allocation6 + $0x1], 0 }
   0x6   :  { %18 = vsyncpa [#allocation4], 0 }
   0x7   :  { %20 = vsyncpa [#allocation4 + $0x1], 0  ;;  %s986_s24 = smov 0   ;;  %s988_s25 = smov 0  }
   0x8   :  { %s990_s26 = smov 0   ;;  %s992_s27 = smov 0  }
   0x9 LB: > { %s1007_s28 = sadd.s32 4294967295, %s939_s27   ;;  %s717_s29 = sadd.s32 4294967294, %s939_s27   ;;  %s939_s27 = sphi %s992_s27, %s1249_s27   ;;  %s935_s26 = sphi %s990_s26, %s1248_s26   ;;  %s931_s25 = sphi %s988_s25, %s1247_s25   ;;  %s927_s24 = sphi %s986_s24, %s1246_s24  }
   0xa   : > { %s1011_s30 = sadd.s32 1, %s939_s27   ;;  %s33_s8 = sadd.s32 1, %s935_s26 }
   0xb   : > { %s30_s9 = ssub.s32 %s939_s27, %s1011_s30  ;;  %p40_p0 = scmp.ne.s32.totalorder %s935_s26, %s931_s25 }
   0xc   : > { %p31_p1 = scmp.eq.s32.totalorder %s30_s9, 0  ;;  %p41_p2 = scmp.eq.s32.totalorder %s939_s27, 0 }
   0xd   : > { %p46_p3 = scmp.ne.s32.totalorder %s931_s25, %s927_s24  ;;  %p47_p4 = scmp.eq.s32.totalorder %s1007_s28, 0 }
   0xe   : > { %s1023_s10 = scalar_select %p31_p1, %s935_s26, %s33_s8  }
   0xf   : > { %p1025_p5 = por %p41_p2, %p40_p0  ;;  %p1029_p6 = por %p47_p4, %p46_p3 }
  0x10   : > { %p201_p7 = scmp.eq.s32.totalorder %s1007_s28, 1  ;;  %p207_p8 = scmp.eq.s32.totalorder %s717_s29, 1 }
  0x11   : > { %s1231_s12 = scalar_select %p1029_p6, 1, 0 }
  0x12   : > { %p762_p10 = scmp.lt.s32.totalorder %s939_s27, 2  ;;  %p1036_p11 = por %p201_p7, %p40_p0 }
  0x13   : > { %p1040_p12 = por %p207_p8, %p46_p3  ;;  %s1045_s15 = sand.u32 1, %s935_s26  }
  0x14   : > { %s1232_s13 = scalar_select %p1036_p11, 1, 0 }
  0x15   : > { %s1233_s14 = scalar_select %p1040_p12, 1, 0 }
  0x16   : > { %s1226_s16 = sshll.u32 %s939_s27, 8  ;;  %s1225_s17 = sshll.u32 %s1045_s15, 4 }
  0x17   : > { %s1234_s0 = sld [smem:[#allocation11_spill]]  ;;  %s246_s21 = scalar_lea.vmem [#allocation2], %s1225_s17 }
  0x18   : > { %s254_s22 = sshll.u32 %s246_s21, 4  ;;  %p1060_p13 = pnand %p762_p10, %p1025_p5  ;;  %s1064_s22 = int_to_ptr.vmem [resolvable:$true] %s254_s22 }
  0x19   : > { %s243_s29 = scalar_lea.sflag [#allocation3], %s1045_s15 }
  0x1a   : > { %p817_p3 = pneg %p1060_p13 }
  0x1d   : > { %s1054_s20 = scalar_lea.hbm %s1234_s0, %s1226_s16  ;;  %s820_s18 = scalar_lea.hbm %s1234_s0, 512 }
  0x1e   : > { %s815_s8 = scalar_lea.hbm %s1054_s20, 256  ;;  %p821_p5 = scmp.lt.s32.totalorder %s1054_s20, %s1234_s0 }
  0x1f   : > { %p816_p2 = scmp.ne.s32.totalorder %s1054_s20, %s815_s8  ;;  %p822_p8 = scmp.lt.s32.totalorder %s820_s18, %s815_s8 }
  0x21   : > { %p818_p4 = pnand %p817_p3, %p816_p2  ;;  %p823_p10 = por %p822_p8, %p821_p5 }
  0x23   : > { %p819_p7 = pneg %p818_p4 }
  0x25   : > { %p824_p9 = pnand %p823_p10, %p819_p7 }
  0x27   : > { %827 = shalt.err (!%p824_p9)
}
  0x28   : > { %s828_s17 = scalar_lea.vmem %s1064_s22, 256  ;;  %s941_s9 = smov [#allocation2]  }
  0x29   : > { %p829_p0 = scmp.ne.s32.totalorder %s1064_s22, %s828_s17  ;;  %s833_s11 = sshll.u32 %s941_s9, 4  ;;  %s834_s11 = int_to_ptr.vmem [resolvable:$false] %s833_s11 }
  0x2a   : > { %s835_s16 = scalar_lea.vmem %s834_s11, 512  ;;  %p836_p1 = scmp.lt.s32.totalorder %s1064_s22, %s834_s11 }
  0x2b   : > { %p831_p2 = pnand %p829_p0, %p817_p3  ;;  %p837_p12 = scmp.lt.s32.totalorder %s835_s16, %s828_s17 }
  0x2d   : > { %p832_p4 = pneg %p831_p2  ;;  %p838_p11 = por %p837_p12, %p836_p1 }
  0x2f   : > { %p839_p5 = pnand %p838_p11, %p832_p4 }
  0x31   : > { %842 = shalt.err (!%p839_p5)
}
  0x32   : > { %754 = dma.hbm_to_vmem [thread:$0]  (!%p1060_p13), %s1054_s20, 256, %s1064_s22, %s243_s29  }
  0x33   : > { %p1236_p9 = scmp.lt.s32.totalorder %s939_s27, 3  ;;  %p1237_p0 = scmp.ge.s32.totalorder %s939_s27, 1 }
  0x34   : > { %s1239_s16 = sshll.u32 %s939_s27, 8  ;;  %s1240_s21 = sshll.u32 %s1045_s15, 4 }
  0x35   : > { %p1097_p7 = pnand %p1237_p0, %p1236_p9  ;;  %s1106_s19 = scalar_lea.hbm %s1218_s1, %s1239_s16 }
  0x36   : > { %s265_s9 = scalar_lea.vmem [#allocation5], %s1240_s21  ;;  %s262_s20 = scalar_lea.sflag [#allocation6], %s1045_s15 }
  0x37   : > { %s1238_s8 = scalar_select %p1097_p7, 1, 0 }
  0x38   : > { %s273_s11 = sshll.u32 %s265_s9, 4  ;;  %s843_s22 = scalar_lea.hbm %s1106_s19, 256  ;;  %s274_s11 = int_to_ptr.vmem [resolvable:$true] %s273_s11 }
  0x39   : > { %p844_p11 = scmp.ne.s32.totalorder %s1106_s19, %s843_s22  ;;  %s848_s17 = scalar_lea.hbm %s1218_s1, 512 }
  0x3a   : > { %p849_p8 = scmp.lt.s32.totalorder %s1106_s19, %s1218_s1  ;;  %p850_p10 = scmp.lt.s32.totalorder %s848_s17, %s843_s22 }
  0x3b   : > { %p846_p12 = pnand %p844_p11, %p817_p3 }
  0x3c   : > { %p851_p2 = por %p850_p10, %p849_p8 }
  0x3d   : > { %p847_p1 = pneg %p846_p12 }
  0x3f   : > { %p852_p4 = pnand %p851_p2, %p847_p1 }
  0x41   : > { %855 = shalt.err (!%p852_p4)
}
  0x42   : > { %s856_s21 = scalar_lea.vmem %s274_s11, 256  ;;  %s942_s15 = smov [#allocation5]  }
  0x43   : > { %p857_p5 = scmp.ne.s32.totalorder %s274_s11, %s856_s21  ;;  %s861_s9 = sshll.u32 %s942_s15, 4  ;;  %s862_s9 = int_to_ptr.vmem [resolvable:$false] %s861_s9 }
  0x44   : > { %s863_s0 = scalar_lea.vmem %s862_s9, 512  ;;  %p864_p11 = scmp.lt.s32.totalorder %s274_s11, %s862_s9 }
  0x45   : > { %p859_p9 = pnand %p857_p5, %p817_p3  ;;  %p865_p12 = scmp.lt.s32.totalorder %s863_s0, %s856_s21 }
  0x47   : > { %p860_p0 = pneg %p859_p9  ;;  %p866_p6 = por %p865_p12, %p864_p11 }
  0x49   : > { %p867_p7 = pnand %p866_p6, %p860_p0 }
  0x4b   : > { %870 = shalt.err (!%p867_p7)
}
  0x4c   : > { %757 = dma.hbm_to_vmem [thread:$0]  (!%p1060_p13), %s1106_s19, 256, %s274_s11, %s262_s20  }
  0x4d   : > { %p1241_p1 = scmp.ne.s32.totalorder %s1238_s8, 0 }
  0x4e   : > { %s1132_s22 = sand.u32 (!%p1241_p1), 1, %s931_s25   ;;  %p1242_p6 = scmp.ne.s32.totalorder (!%p1241_p1), %s1231_s12, 0 }
  0x4f   : > { %282 = sbr.rel (%p1241_p1) target bundleno = 674 (0x2a2), region = 48  ;;  %s1135_s29 = sshll.u32 (!%p1241_p1), %s1132_s22, 4 }
  0x50   : > { %s285_s17 = scalar_lea.sflag (!%p1241_p1), [#allocation3], %s1132_s22  ;;  %s288_s16 = scalar_lea.vmem (!%p1241_p1), [#allocation2], %s1135_s29 }
  0x54   : > { %914 = dma.done.wait (%p1242_p6), %s285_s17, 256  }
  0x55   : > { %916 = vsyncadd (%p1242_p6), %s285_s17, 4294967040  ;;  %s294_s23 = scalar_lea.sflag [#allocation6], %s1132_s22  ;;  %s297_s8 = scalar_lea.vmem [#allocation5], %s1135_s29 }
  0x56   : > { %918 = dma.done.wait (%p1242_p6), %s294_s23, 256  }
  0x57   : > { %920 = vsyncadd (%p1242_p6), %s294_s23, 4294967040  ;;  %v943_v0 = vmov 0.0   ;;  %v944_v1 = vmov 0   ;;  %v1149_v2 = vld [vmem:[%s288_s16 + $0x8] sm:$0xff]  ;;  %v1151_v4 = vld [vmem:[%s288_s16] sm:$0xff]  ;;  %vm347_vm0 = vcmask 64512  }
  0x58   : > { %415 = vmatprep.mubr.f32.mxu0 %v943_v0  ;;  %506 = vmatprep.mubr.f32.mxu1 %v943_v0  ;;  %v341_v3 = vld [vmem:[%s297_s8 + $0x8] sm:$0xff]  ;;  %v340_v5 = vld [vmem:[%s297_s8] sm:$0xff]  ;;  %s744_s16 = sshll.u32 %s1007_s28, 8  ;;  %s332_s23 = scalar_lea.vmem [#allocation7], %s1135_s29 }
  0x59   : > { %798 = vset.pattern.permute.xlu0 %v944_v1  ;;  %381 = vmatprep.subr.mxu0 %v1149_v2  ;;  %v333_v6 = vld [vmem:[%s1219_s2] sm:$0xff]  ;;  %s624_s8 = sshll.u32 %s332_s23, 4  ;;  %s1180_s12 = scalar_lea.hbm %s1224_s7, %s744_s16  ;;  %s625_s8 = int_to_ptr.vmem [resolvable:$true] %s624_s8 }
  0x5a   : > { %472 = vmatprep.subr.mxu1 %v341_v3  ;;  %v335_v7 = vld [vmem:[%s1221_s4] sm:$0xff]  ;;  %382 = vmatpush1.msra.mxu0 %v1151_v4  ;;  %s610_s20 = scalar_lea.sflag [#allocation4], %s1132_s22  ;;  %s871_s18 = scalar_lea.vmem %s625_s8, 256 }
  0x5b   : > { %473 = vmatpush1.msra.mxu1 %v340_v5  ;;  %v336_v8 = vld [vmem:[%s1222_s5] sm:$0xff]  ;;  %730 = vmatmul.mubr.msk.f32.vlgmr.msra.gmra.mxu0 %vm347_vm0, %v333_v6  ;;  %p872_p13 = scmp.ne.s32.totalorder %s625_s8, %s871_s18  ;;  %p1243_p3 = scmp.ne.s32.totalorder %s1232_s13, 0 }
  0x5c   : > { %733 = vmatmul.mubr.msk.f32.vlgmr.msra.gmra.mxu1 %vm347_vm0, %v335_v7  ;;  %436 = vperm.xlu0 %798, %v336_v8   ;;  %v334_v9 = vld [vmem:[%s1220_s3] sm:$0xff]  ;;  %s945_s28 = smov [#allocation7]  }
  0x5d   : > { %v736_v36 = vld [vmem:[%s1223_s6] ss:$0 sm:$0xff]  ;;  %p873_p7 = pnand %p872_p13, %p1243_p3  ;;  %s875_s29 = sshll.u32 %s945_s28, 4  ;;  %s876_s29 = int_to_ptr.vmem [resolvable:$false] %s875_s29 }
  0x5e   : > { %s877_s21 = scalar_lea.vmem %s876_s29, 512  ;;  %p878_p10 = scmp.lt.s32.totalorder %s625_s8, %s876_s29 }
  0x5f   : > { %p874_p8 = pneg %p873_p7  ;;  %p879_p2 = scmp.lt.s32.totalorder %s877_s21, %s871_s18 }
  0x60   : > { %344 = vperm.xlu0 %798, %v334_v9  }
  0x61   : > { %p880_p4 = por %p879_p2, %p878_p10 }
  0x63   : > { %p881_p5 = pnand %p880_p4, %p874_p8 }
  0xd7   : > { %v437_v10 = vpop.permute.xlu0 %436 }
  0xdb   : > { %v345_v11 = vpop.permute.xlu0 %344 }
 0x11b   : > { %v417_v12 = vpop.f32.mrf.mxu0 }
 0x11c   : > { %v508_v13 = vpop.f32.mrf.mxu1  ;;  %v418_v15 = vadd.f32 %v417_v12, %v345_v11 }
 0x11d   : > { %v509_v14 = vadd.f32 %v508_v13, %v437_v10  ;;  %v419_v17 = vpop.f32.mrf.mxu0 }
 0x11e   : > { %v510_v16 = vpop.f32.mrf.mxu1  ;;  %v731_v20 = vmul.f32 -1.442695, %v418_v15  ;;  %v420_v21 = vadd.f32 %v419_v17, %v345_v11 }
 0x11f   : > { %v734_v18 = vmul.f32 -1.442695, %v509_v14  ;;  %v511_v19 = vadd.f32 %v510_v16, %v437_v10 }
 0x120   : > { %v732_v23 = vmul.f32 -1.442695, %v420_v21 }
 0x121   : > { %799 = vpow2.f32 %v734_v18  ;;  %v735_v22 = vmul.f32 -1.442695, %v511_v19 }
 0x122   : > { %801 = vpow2.f32 %v731_v20 }
 0x123   : > { %803 = vpow2.f32 %v735_v22 }
 0x124   : > { %805 = vpow2.f32 %v732_v23 }
 0x12e   : > { %v800_v24 = vpop.eup %799 }
 0x12f   : > { %v802_v25 = vpop.eup %801  ;;  %v519_v26 = vadd.f32 1.0, %v800_v24 }
 0x130   : > { %v804_v27 = vpop.eup %803  ;;  %v428_v31 = vadd.f32 1.0, %v802_v25 }
 0x131   : > { %v806_v28 = vpop.eup %805  ;;  %v520_v29 = vadd.f32 1.0, %v804_v27  ;;  %807 = vrcp.f32 %v519_v26 }
 0x132   : > { %v429_v30 = vadd.f32 1.0, %v806_v28 }
 0x133   : > { %809 = vrcp.f32 %v520_v29 }
 0x134   : > { %811 = vrcp.f32 %v429_v30 }
 0x135   : > { %813 = vrcp.f32 %v428_v31 }
 0x13e   : > { %v808_v32 = vpop.eup %807 }
 0x140   : > { %v810_v33 = vpop.eup %809 }
 0x141   : > { %v812_v34 = vpop.eup %811  ;;  %555 = vmatprep.subr.mxu0 %v810_v33 }
 0x142   : > { %589 = vmatprep.mubr.f32.mxu0 %v812_v34  ;;  %556 = vmatpush1.xpose.msra.mxu0 %v808_v32  ;;  %v814_v35 = vpop.eup %813 }
 0x145   : > { %590 = vmatmul.mubr.f32.vlgmr.msra.gmra.mxu0 %v814_v35 }
 0x205   : > { %v591_v37 = vpop.f32.mrf.mxu0 }
 0x206   : > { %v601_v38 = vmul.f32 %v736_v36, %v591_v37 }
 0x207   : > { %v593_v39 = vpop.f32.mrf.mxu0 }
 0x208   : > { %v602_v40 = vsel %vm347_vm0, %v601_v38, 0.0 }
 0x209   : > { %603 = vadd.xlane.f32.xlu1 %v602_v40 }
 0x292   : > { %v604_v41 = vpop.xlane.xlu1 %603 }
 0x293   : > { %v605_v42 = vmul.f32 %v604_v41, %v1151_v4  ;;  %v606_v43 = vmul.f32 %v604_v41, %v1149_v2 }
 0x295   : > { %607 = vst [vmem:[%s332_s23] sm:$0xff] %v605_v42  ;;  %608 = vst [vmem:[%s332_s23 + $0x8] sm:$0xff] %v606_v43 }
 0x296   : > { %884 = shalt.err (!%p881_p5)
}
 0x297   : > { %s885_s15 = scalar_lea.hbm %s1180_s12, 256  ;;  %s889_s0 = scalar_lea.hbm %s1224_s7, 512 }
 0x298   : > { %p886_p9 = scmp.ne.s32.totalorder %s1180_s12, %s885_s15  ;;  %p890_p12 = scmp.lt.s32.totalorder %s1180_s12, %s1224_s7 }
 0x299   : > { %p891_p1 = scmp.lt.s32.totalorder %s889_s0, %s885_s15 }
 0x29a   : > { %p887_p0 = pnand %p886_p9, %p1243_p3 }
 0x29b   : > { %p892_p6 = por %p891_p1, %p890_p12 }
 0x29c   : > { %p888_p11 = pneg %p887_p0 }
 0x29e   : > { %p893_p13 = pnand %p892_p6, %p888_p11 }
 0x2a0   : > { %896 = shalt.err (!%p893_p13)
}
 0x2a1   : > { %749 = dma.vmem_to_hbm [thread:$0]  (%p1243_p3), %s625_s8, 256, %s1180_s12, %s610_s20  }
 0x2a2 PF: > { %s636_s23 = sand.u32 1, %s927_s24   ;;  %p1244_p7 = scmp.ne.s32.totalorder %s1233_s14, 0 }
 0x2a3   : > { %p1245_p8 = scmp.ge.s32.totalorder %s939_s27, 2  ;;  %s637_s19 = scalar_lea.sflag [#allocation4], %s636_s23 }
 0x2a5   : > { %p759_p10 = pnand %p1245_p8, %p1244_p7 }
 0x2a7   : > { %p760_p2 = pneg %p759_p10 }
 0x2a9   : > { %922 = dma.done.wait (%p760_p2), %s637_s19, 256  }
 0x2aa   : > { %924 = vsyncadd (%p760_p2), %s637_s19, 4294967040  ;;  %p23_p4 = scmp.ge.s32.totalorder %s1011_s30, 4   ;;  %s1246_s24 = smov %s931_s25 }
 0x2ab   : > { %s1247_s25 = smov %s935_s26  ;;  %s1248_s26 = smov %s1023_s10 }
 0x2ac   : > { %s1249_s27 = smov %s1011_s30  ;;  %25 = sbr.rel (!%p23_p4) target bundleno = 9 (0x9), region = 106 }
 0x2b1   :  { %642 = vsyncpa [#allocation3], 1 }
 0x2b2   :  { %644 = vsyncpa [#allocation3 + $0x1], 1 }
 0x2b3   :  { %645 = vsyncpa [#allocation6], 1 }
 0x2b4   :  { %647 = vsyncpa [#allocation6 + $0x1], 1 }
 0x2b5   :  { %648 = vsyncpa [#allocation4], 1 }
 0x2b6   :  { %650 = vsyncpa [#allocation4 + $0x1], 1 }

</bundles_post_ra>
